<compile_context>
chip_gen: v7x
topology: tpu7x:2x2x1
jax: 0.10.0
libtpu: 0.0.40
codegen_flags: <defaults>
</compile_context>

<pallas_src>
import jax
import jax.numpy as jnp
from jax.experimental import pallas as pl
from jax.experimental.pallas import tpu as pltpu


def _round_up(x: int, m: int) -> int:
    return ((x + m - 1) // m) * m


def _default_lane_multiple() -> int:
    """MXU-facing dim rounding: 128 for v5e and older (4x128x128 MXU),
    256 for v6e/v7x (2x256x256 MXU)."""
    try:
        kind = jax.devices()[0].device_kind.lower()
    except Exception:
        return 128
    for tag in ("v2", "v3", "v4", "v5"):
        if tag in kind:
            return 128
    return 256


def prepare_params(W, b, *, compute_dtype=jnp.float32, lane_multiple=None):
    """One-time weight preparation (call at init, NOT per forward).

    Pads to lane multiples, materializes both W (Np, Fp) and W_T (Fp, Np) so
    BOTH matmuls in the kernel are canonical (M,K)x(K,N) contractions, and
    optionally casts weights to bf16 (f32 accumulation stays in the kernel).
    Zero padding is numerically exact through both matmuls, bias add and ReLU.
    """
    neurons, features = W.shape
    if lane_multiple is None:
        lane_multiple = _default_lane_multiple()
    fp = _round_up(features, lane_multiple)
    np_ = _round_up(neurons, lane_multiple)

    w_p = jnp.pad(W, ((0, np_ - neurons), (0, fp - features))).astype(compute_dtype)
    wt_p = jnp.asarray(w_p.T)                       # (Fp, Np), materialized once
    b_p = jnp.pad(b, (0, fp - features)).reshape(1, fp).astype(jnp.float32)

    return dict(w=w_p, wt=wt_p, b=b_p,
                features=features, neurons=neurons, fp=fp, np=np_)


def hidden_layer_kernel(x_ref, wt_ref, w_ref, b_ref, out_ref):
    """Fused (x @ W_T) -> relu -> (@ W) -> +b -> relu on one batch tile."""
    wt = wt_ref[...]                                # (Fp, Np)
    w = w_ref[...]                                  # (Np, Fp)
    x = x_ref[...].astype(wt.dtype)                 # (Bt, Fp)
    b = b_ref[...]                                  # (1,  Fp) f32

    # h = x @ W.T expressed as canonical (M,K)x(K,N) on the pre-transposed
    # weight -> straight MXU feed, f32 accumulation.
    h = jnp.dot(x, wt, preferred_element_type=jnp.float32)   # (Bt, Np)
    h = jnp.maximum(h, 0.0)                                   # ReLU (VPU)

    # y = h @ W (already canonical), f32 accumulation.
    y = jnp.dot(h.astype(w.dtype), w, preferred_element_type=jnp.float32)
    y = jnp.maximum(y + b, 0.0)                               # bias + ReLU

    out_ref[...] = y.astype(out_ref.dtype)


def hidden_layer_forward(x, params, *, batch_tile=256):
    """Returns (y, 0) matching HiddenLayerModel.forward (act_fn='ReLU')."""
    batch, features = x.shape
    assert features == params["features"], "feature dim mismatch"
    fp, np_ = params["fp"], params["np"]
    wt_p, w_p, b_p = params["wt"], params["w"], params["b"]

    # Only the activation is padded per call (it changes every call); weights
    # were padded/transposed once at init.
    bp8 = _round_up(batch, 8)
    if bp8 <= batch_tile:
        bt, bp, grid = bp8, bp8, None               # gridless fast path
    else:
        bt = batch_tile
        bp = _round_up(batch, batch_tile)
        grid = (bp // bt,)                          # batch-parallel grid

    x_p = jnp.pad(x, ((0, bp - batch), (0, fp - features)))

    # VMEM budget: both weight copies + double-buffered x/out tiles + live h.
    w_bytes = w_p.size * w_p.dtype.itemsize + wt_p.size * wt_p.dtype.itemsize
    tile_bytes = 2 * bt * fp * (x_p.dtype.itemsize + 4)       # x + out, 2-deep
    h_bytes = bt * np_ * 4
    need = w_bytes + tile_bytes + h_bytes + fp * 4
    vmem_limit = min(max(int(need * 1.5) + (4 << 20), 16 << 20), 128 << 20)

    out_shape = jax.ShapeDtypeStruct((bp, fp), x.dtype)

    if grid is None:
        cp = pltpu.CompilerParams(vmem_limit_bytes=vmem_limit)
        vmem = pl.BlockSpec(memory_space=pltpu.MemorySpace.VMEM)
        y_p = pl.pallas_call(
            hidden_layer_kernel,
            out_shape=out_shape,
            in_specs=[vmem, vmem, vmem, vmem],
            out_specs=vmem,
            compiler_params=cp,
        )(x_p, wt_p, w_p, b_p)
    else:
        cp = pltpu.CompilerParams(dimension_semantics=("parallel",),
                                  vmem_limit_bytes=vmem_limit)
        y_p = pl.pallas_call(
            hidden_layer_kernel,
            out_shape=out_shape,
            grid=grid,
            in_specs=[
                pl.BlockSpec((bt, fp), lambda i: (i, 0)),     # x tile
                pl.BlockSpec((fp, np_), lambda i: (0, 0)),    # W_T resident
                pl.BlockSpec((np_, fp), lambda i: (0, 0)),    # W   resident
                pl.BlockSpec((1, fp), lambda i: (0, 0)),      # bias resident
            ],
            out_specs=pl.BlockSpec((bt, fp), lambda i: (i, 0)),
            compiler_params=cp,
        )(x_p, wt_p, w_p, b_p)

    # Slice back to the logical shape (padded batch rows hold relu(b); dropped).
    return y_p[:batch, :features], 0


if __name__ == "__main__":
    # Small shapes consistent with the module: batch=8, neurons=16, features=32.
    batch, neurons, features = 8, 16, 32

    key = jax.random.PRNGKey(0)
    k_x, k_w, k_b = jax.random.split(key, 3)
    x = jax.random.normal(k_x, (batch, features), dtype=jnp.float32)
    W = jax.random.normal(k_w, (neurons, features), dtype=jnp.float32)  # torch.randn(neurons, features)
    b = jax.random.normal(k_b, (features,), dtype=jnp.float32)          # torch.randn(features)

    # f32 weights here for exact parity with the reference; pass
    # compute_dtype=jnp.bfloat16 at scale for ~2-3x MXU throughput (relax tol).
    params = prepare_params(W, b, compute_dtype=jnp.float32)

    y, aux = hidden_layer_forward(x, params)
    y = jax.block_until_ready(y)

    # Pure-JAX reference check (f32 path).
    h_ref = jnp.maximum(x @ W.T, 0.0)
    y_ref = jnp.maximum(h_ref @ W + b, 0.0)
    assert y.shape == (batch, features)
    assert jnp.allclose(y, y_ref, atol=1e-5, rtol=1e-5), "mismatch vs reference"
    assert aux == 0

    # Also exercise the batch-tiled "parallel" grid path (scale / v7x 2-TC readiness).
    big_batch = 1024
    xb = jax.random.normal(k_x, (big_batch, features), dtype=jnp.float32)
    yb, _ = hidden_layer_forward(xb, params, batch_tile=256)
    yb = jax.block_until_ready(yb)
    hb_ref = jnp.maximum(xb @ W.T, 0.0)
    yb_ref = jnp.maximum(hb_ref @ W + b, 0.0)
    assert jnp.allclose(yb, yb_ref, atol=1e-4, rtol=1e-4), "mismatch (tiled path)"

    # TODO(synk): layer_cache / plots / activations_graph are host-side
    # visualization (plotly), not kernel work; GeLU/SoLU act_fn variants not wired.
    print("KERNEL_OK")
</pallas_src>

<mosaic_0001>
module attributes {stable_mosaic.version = 11 : i64} {
  func.func @hidden_layer_kernel(%arg0: memref<8x256xf32, #tpu.memory_space<vmem>>, %arg1: memref<256x256xf32, #tpu.memory_space<vmem>>, %arg2: memref<256x256xf32, #tpu.memory_space<vmem>>, %arg3: memref<1x256xf32, #tpu.memory_space<vmem>>, %arg4: memref<8x256xf32, #tpu.memory_space<vmem>>) attributes {dimension_semantics = [], scalar_prefetch = 0 : i64, scratch_operands = 0 : i64, tpu.core_type = #tpu.core_type<tc>} {
    %c0 = arith.constant 0 : index
    %c0_0 = arith.constant 0 : index
    %0 = vector.load %arg1[%c0, %c0_0] : memref<256x256xf32, #tpu.memory_space<vmem>>, vector<256x256xf32>
    %c0_1 = arith.constant 0 : index
    %c0_2 = arith.constant 0 : index
    %1 = vector.load %arg2[%c0_1, %c0_2] : memref<256x256xf32, #tpu.memory_space<vmem>>, vector<256x256xf32>
    %c0_3 = arith.constant 0 : index
    %c0_4 = arith.constant 0 : index
    %2 = vector.load %arg0[%c0_3, %c0_4] : memref<8x256xf32, #tpu.memory_space<vmem>>, vector<8x256xf32>
    %c0_5 = arith.constant 0 : index
    %c0_6 = arith.constant 0 : index
    %3 = vector.load %arg3[%c0_5, %c0_6] : memref<1x256xf32, #tpu.memory_space<vmem>>, vector<1x256xf32>
    %cst = arith.constant dense<0.000000e+00> : vector<8x256xf32>
    %4 = tpu.matmul %2, %0, %cst {dimension_numbers = #tpu.dot_dimension_numbers<[1], [0], [0], [1], [0, 0, 1, 1], [], []>} : vector<8x256xf32>, vector<256x256xf32>, vector<8x256xf32> -> vector<8x256xf32>
    %cst_7 = arith.constant 0.000000e+00 : f32
    %5 = vector.broadcast %cst_7 : f32 to vector<8x256xf32>
    %6 = arith.maximumf %4, %5 : vector<8x256xf32>
    %cst_8 = arith.constant dense<0.000000e+00> : vector<8x256xf32>
    %7 = tpu.matmul %6, %1, %cst_8 {dimension_numbers = #tpu.dot_dimension_numbers<[1], [0], [0], [1], [0, 0, 1, 1], [], []>} : vector<8x256xf32>, vector<256x256xf32>, vector<8x256xf32> -> vector<8x256xf32>
    %8 = vector.broadcast %3 : vector<1x256xf32> to vector<8x256xf32>
    %9 = arith.addf %7, %8 : vector<8x256xf32>
    %cst_9 = arith.constant 0.000000e+00 : f32
    %10 = vector.broadcast %cst_9 : f32 to vector<8x256xf32>
    %11 = arith.maximumf %9, %10 : vector<8x256xf32>
    %c0_10 = arith.constant 0 : index
    %c0_11 = arith.constant 0 : index
    %12 = vector.load %arg4[%c0_10, %c0_11] : memref<8x256xf32, #tpu.memory_space<vmem>>, vector<8x256xf32>
    tpu.vector_store %arg4[%c0_10, %c0_11], %11 {strides = array<i32>} : memref<8x256xf32, #tpu.memory_space<vmem>>, vector<8x256xf32>,
    return
  }
}

</mosaic_0001>

<bundles_post_ra>
// kernel: tpu_custom_call.1
= control target key start
LH: loop header
LB: loop body
LE: loop exit
PB: predicated region body
PF: predicated region fallthrough
CT: control target
= control target key end

     0   :  { %9 = vsyncpa [#allocation3], 0  ;;  %s679_s0 = inlined_call_operand.hbm [shape: f32[8,256], index: 0, kind: input, shape index: {}]   ;;  %s680_s1 = inlined_call_operand.hbm [shape: f32[256,256], index: 1, kind: input, shape index: {}]   ;;  %s681_s2 = inlined_call_operand.hbm [shape: f32[256,256], index: 2, kind: input, shape index: {}]   ;;  %s682_s3 = inlined_call_operand.vmem [shape: f32[1,256], index: 3, kind: input, shape index: {}]   ;;  %s683_s4 = inlined_call_operand.hbm [shape: f32[8,256], index: 4, kind: output, shape index: {}]  }
   0x1   :  { %10 = vsyncpa [#allocation6], 0 }
   0x2   :  { %11 = vsyncpa [#allocation4], 0  ;;  %s591_s15 = smov [#allocation5]   ;;  %s497_s19 = scalar_lea.hbm %s680_s1, 8192 }
   0x3   :  { %s27_s16 = sshll.u32 %s591_s15, 4  ;;  %p498_p0 = scmp.ne.s32.totalorder %s680_s1, %s497_s19  ;;  %s28_s16 = int_to_ptr.vmem [resolvable:$true] %s27_s16 }
   0x4   :  { %p501_p1 = scmp.lt.u32.totalorder %s497_s19, %s680_s1 }
   0x6   :  { %p503_p2 = pnand %p501_p1, %p498_p0 }
   0x8   :  { %506 = shalt.err (!%p503_p2)
}
   0x9   :  { %s507_s24 = scalar_lea.vmem %s28_s16, 8192  ;;  %p512_p4 = scmp.lt.s32.totalorder %s28_s16, %s28_s16 }
   0xa   :  { %p508_p3 = scmp.ne.s32.totalorder %s28_s16, %s507_s24  ;;  %p513_p5 = scmp.lt.s32.totalorder %s507_s24, %s507_s24 }
   0xc   :  { %p514_p6 = por %p513_p5, %p512_p4 }
   0xe   :  { %p515_p7 = pnand %p514_p6, %p508_p3 }
  0x10   :  { %518 = shalt.err (!%p515_p7)
}
  0x11   :  { %s592_s25 = smov 256   ;;  %s593_s26 = smov 16  }
  0x12   :  { %33 = dma.hbm_to_vmem [thread:$0]  %s680_s1, 8192, %s28_s16, [#allocation6], %s592_s25, %s592_s25, %s593_s26  }
  0x13   :  { %s594_s29 = smov [#allocation2]   ;;  %s595_s5 = smov [#allocation7]  }
  0x14   :  { %s18_s30 = sshll.u32 %s594_s29, 4  ;;  %s39_s6 = sshll.u32 %s595_s5, 4  ;;  %s19_s30 = int_to_ptr.vmem [resolvable:$true] %s18_s30  ;;  %s40_s6 = int_to_ptr.vmem [resolvable:$true] %s39_s6 }
  0x15   :  { %s519_s9 = scalar_lea.hbm %s679_s0, 256 }
  0x16   :  { %p520_p8 = scmp.ne.s32.totalorder %s679_s0, %s519_s9  ;;  %p523_p9 = scmp.lt.u32.totalorder %s519_s9, %s679_s0 }
  0x18   :  { %p525_p10 = pnand %p523_p9, %p520_p8 }
  0x1a   :  { %528 = shalt.err (!%p525_p10)
}
  0x1b   :  { %s529_s1 = scalar_lea.vmem %s19_s30, 256  ;;  %p534_p12 = scmp.lt.s32.totalorder %s19_s30, %s19_s30 }
  0x1c   :  { %p530_p11 = scmp.ne.s32.totalorder %s19_s30, %s529_s1  ;;  %p535_p13 = scmp.lt.s32.totalorder %s529_s1, %s529_s1 }
  0x1e   :  { %p536_p0 = por %p535_p13, %p534_p12 }
  0x20   :  { %p537_p1 = pnand %p536_p0, %p530_p11 }
  0x22   :  { %540 = shalt.err (!%p537_p1)
}
  0x23   :  { %21 = dma.hbm_to_vmem [thread:$0]  %s679_s0, 256, %s19_s30, [#allocation3]  }
  0x24   :  { %s541_s18 = scalar_lea.hbm %s681_s2, 8192 }
  0x25   :  { %p542_p2 = scmp.ne.s32.totalorder %s681_s2, %s541_s18  ;;  %p545_p3 = scmp.lt.u32.totalorder %s541_s18, %s681_s2 }
  0x27   :  { %p547_p4 = pnand %p545_p3, %p542_p2 }
  0x29   :  { %550 = shalt.err (!%p547_p4)
}
  0x2a   :  { %s551_s23 = scalar_lea.vmem %s40_s6, 8192  ;;  %p556_p6 = scmp.lt.s32.totalorder %s40_s6, %s40_s6 }
  0x2b   :  { %p552_p5 = scmp.ne.s32.totalorder %s40_s6, %s551_s23  ;;  %p557_p7 = scmp.lt.s32.totalorder %s551_s23, %s551_s23 }
  0x2d   :  { %p558_p8 = por %p557_p7, %p556_p6 }
  0x2f   :  { %p559_p9 = pnand %p558_p8, %p552_p5 }
  0x31   :  { %562 = shalt.err (!%p559_p9)
}
  0x32   :  { %45 = dma.hbm_to_vmem [thread:$0]  %s681_s2, 8192, %s40_s6, [#allocation6], %s592_s25, %s592_s25, %s593_s26  }
  0x33   :  { %585 = dma.done.wait [#allocation3], 256  }
  0x34   :  { %586 = vsyncadd [#allocation3], 4294967040 }
  0x35   :  { %587 = dma.done.wait [#allocation6], 16384  }
  0x36   :  { %588 = vsyncadd [#allocation6], 4294950912  ;;  %v58_v0 = vld [vmem:[#allocation5 + $0x8] sm:$0xff]  ;;  %v60_v1 = vld [vmem:[#allocation5 + $0x18] sm:$0xff]  ;;  %s596_s26 = smov [#allocation8]  }
  0x37   :  { %v57_v2 = vld [vmem:[#allocation5] sm:$0xff]  ;;  %v363_v3 = vpack.c.bf16 %v60_v1, %v58_v0  ;;  %v59_v4 = vld [vmem:[#allocation5 + $0x10] sm:$0xff]  ;;  %v62_v5 = vld [vmem:[#allocation5 + $0x28] sm:$0xff]  ;;  %s353_s27 = sshll.u32 %s596_s26, 4  ;;  %s354_s27 = int_to_ptr.vmem [resolvable:$true] %s353_s27 }
  0x38   :  { %v64_v6 = vld [vmem:[#allocation5 + $0x38] sm:$0xff]  ;;  %v365_v7 = vpack.c.bf16 %v59_v4, %v57_v2  ;;  %v61_v9 = vld [vmem:[#allocation5 + $0x20] sm:$0xff]  ;;  %v63_v10 = vld [vmem:[#allocation5 + $0x30] sm:$0xff]  ;;  %s563_s28 = scalar_lea.vmem %s354_s27, 256  ;;  %p568_p11 = scmp.lt.s32.totalorder %s354_s27, %s354_s27 }
  0x39   :  { %v367_v8 = vpack.c.bf16 %v64_v6, %v62_v5  ;;  %v66_v11 = vld [vmem:[#allocation5 + $0x48] sm:$0xff]  ;;  %364 = vmatprep.subr.bf16.mxu0 %v363_v3  ;;  %v68_v12 = vld [vmem:[#allocation5 + $0x58] sm:$0xff]  ;;  %v369_v13 = vpack.c.bf16 %v63_v10, %v61_v9  ;;  %v65_v15 = vld [vmem:[#allocation5 + $0x40] sm:$0xff]  ;;  %p564_p10 = scmp.ne.s32.totalorder %s354_s27, %s563_s28  ;;  %p569_p12 = scmp.lt.s32.totalorder %s563_s28, %s563_s28 }
  0x3a   :  { %366 = vmatpush1.bf16.msra.mxu0 %v365_v7  ;;  %v371_v14 = vpack.c.bf16 %v68_v12, %v66_v11  ;;  %v67_v16 = vld [vmem:[#allocation5 + $0x50] sm:$0xff]  ;;  %v70_v17 = vld [vmem:[#allocation5 + $0x68] sm:$0xff]  ;;  %v72_v18 = vld [vmem:[#allocation5 + $0x78] sm:$0xff] }
  0x3b   :  { %368 = vmatprep.subr.bf16.mxu0 %v367_v8  ;;  %v373_v19 = vpack.c.bf16 %v67_v16, %v65_v15  ;;  %v375_v20 = vpack.c.bf16 %v72_v18, %v70_v17  ;;  %v69_v21 = vld [vmem:[#allocation5 + $0x60] sm:$0xff]  ;;  %v71_v22 = vld [vmem:[#allocation5 + $0x70] sm:$0xff]  ;;  %v74_v23 = vld [vmem:[#allocation5 + $0x88] sm:$0xff]  ;;  %p570_p13 = por %p569_p12, %p568_p11 }
  0x3c   :  { %v76_v24 = vld [vmem:[#allocation5 + $0x98] sm:$0xff]  ;;  %v377_v25 = vpack.c.bf16 %v71_v22, %v69_v21  ;;  %v73_v27 = vld [vmem:[#allocation5 + $0x80] sm:$0xff]  ;;  %v75_v28 = vld [vmem:[#allocation5 + $0x90] sm:$0xff] }
  0x3d   :  { %v379_v26 = vpack.c.bf16 %v76_v24, %v74_v23  ;;  %v78_v29 = vld [vmem:[#allocation5 + $0xa8] sm:$0xff]  ;;  %v80_v30 = vld [vmem:[#allocation5 + $0xb8] sm:$0xff]  ;;  %v381_v31 = vpack.c.bf16 %v75_v28, %v73_v27  ;;  %v77_v33 = vld [vmem:[#allocation5 + $0xa0] sm:$0xff]  ;;  %p571_p0 = pnand %p570_p13, %p564_p10 }
  0x3e   :  { %370 = vmatpush1.bf16.msra.mxu0 %v369_v13  ;;  %v383_v32 = vpack.c.bf16 %v80_v30, %v78_v29  ;;  %v79_v34 = vld [vmem:[#allocation5 + $0xb0] sm:$0xff]  ;;  %v82_v35 = vld [vmem:[#allocation5 + $0xc8] sm:$0xff]  ;;  %v84_v36 = vld [vmem:[#allocation5 + $0xd8] sm:$0xff] }
  0x3f   :  { %372 = vmatprep.subr.bf16.mxu0 %v371_v14  ;;  %v385_v37 = vpack.c.bf16 %v79_v34, %v77_v33  ;;  %v81_v38 = vld [vmem:[#allocation5 + $0xc0] sm:$0xff]  ;;  %v83_v39 = vld [vmem:[#allocation5 + $0xd0] sm:$0xff]  ;;  %v387_v40 = vpack.c.bf16 %v84_v36, %v82_v35  ;;  %v86_v41 = vld [vmem:[#allocation5 + $0xe8] sm:$0xff] }
  0x40   :  { %v88_v42 = vld [vmem:[#allocation5 + $0xf8] sm:$0xff]  ;;  %v122_v44 = vld [vmem:[#allocation7 + $0x8] sm:$0xff]  ;;  %v121_v46 = vld [vmem:[#allocation7] sm:$0xff]  ;;  %v389_v51 = vpack.c.bf16 %v83_v39, %v81_v38 }
  0x41   :  { %v186_v43 = vld [vmem:[#allocation2 + $0x8] sm:$0xff]  ;;  %v123_v48 = vld [vmem:[#allocation7 + $0x10] sm:$0xff]  ;;  %v126_v49 = vld [vmem:[#allocation7 + $0x28] sm:$0xff]  ;;  %v391_v57 = vpack.c.bf16 %v88_v42, %v86_v41 }
  0x42   :  { %374 = vmatpush1.bf16.msra.mxu0 %v373_v19  ;;  %252 = vmatprep.mubr.f32.mxu0 %v186_v43  ;;  %v124_v45 = vld [vmem:[#allocation7 + $0x18] sm:$0xff]  ;;  %v429_v52 = vpack.c.bf16 %v123_v48, %v121_v46  ;;  %v125_v54 = vld [vmem:[#allocation7 + $0x20] sm:$0xff]  ;;  %v127_v55 = vld [vmem:[#allocation7 + $0x30] sm:$0xff] }
  0x43   :  { %376 = vmatprep.subr.bf16.mxu0 %v375_v20  ;;  %v427_v47 = vpack.c.bf16 %v124_v45, %v122_v44  ;;  %v128_v50 = vld [vmem:[#allocation7 + $0x38] sm:$0xff]  ;;  %v130_v56 = vld [vmem:[#allocation7 + $0x48] sm:$0xff]  ;;  %v85_v58 = vld [vmem:[#allocation5 + $0xe0] sm:$0xff]  ;;  %v433_v63 = vpack.c.bf16 %v127_v55, %v125_v54 }
  0x44   :  { %v431_v53 = vpack.c.bf16 %v128_v50, %v126_v49  ;;  %v87_v59 = vld [vmem:[#allocation5 + $0xf0] sm:$0xff]  ;;  %v132_v60 = vld [vmem:[#allocation7 + $0x58] sm:$0xff]  ;;  %v90_v61 = vld [vmem:[#allocation5 + $0x108] sm:$0xff] }
  0x45   :  { %428 = vmatprep.subr.bf16.mxu1 %v427_v47  ;;  %v92_v62 = vld [vmem:[#allocation5 + $0x118] sm:$0xff]  ;;  %v435_v0 = vpack.c.bf16 %v132_v60, %v130_v56  ;;  %v129_v1 = vld [vmem:[#allocation7 + $0x40] sm:$0xff]  ;;  %v131_v2 = vld [vmem:[#allocation7 + $0x50] sm:$0xff]  ;;  %v393_v3 = vpack.c.bf16 %v87_v59, %v85_v58 }
  0x46   :  { %378 = vmatpush1.bf16.msra.mxu0 %v377_v25  ;;  %430 = vmatpush1.bf16.msra.mxu1 %v429_v52  ;;  %v134_v4 = vld [vmem:[#allocation7 + $0x68] sm:$0xff]  ;;  %v136_v5 = vld [vmem:[#allocation7 + $0x78] sm:$0xff]  ;;  %v395_v6 = vpack.c.bf16 %v92_v62, %v90_v61  ;;  %v89_v7 = vld [vmem:[#allocation5 + $0x100] sm:$0xff]  ;;  %v437_v11 = vpack.c.bf16 %v131_v2, %v129_v1 }
  0x47   :  { %380 = vmatprep.subr.bf16.mxu0 %v379_v26  ;;  %432 = vmatprep.subr.bf16.mxu1 %v431_v53  ;;  %v91_v8 = vld [vmem:[#allocation5 + $0x110] sm:$0xff]  ;;  %v94_v9 = vld [vmem:[#allocation5 + $0x128] sm:$0xff]  ;;  %v96_v10 = vld [vmem:[#allocation5 + $0x138] sm:$0xff]  ;;  %v439_v12 = vpack.c.bf16 %v136_v5, %v134_v4 }
  0x48   :  { %v133_v13 = vld [vmem:[#allocation7 + $0x60] sm:$0xff]  ;;  %v135_v14 = vld [vmem:[#allocation7 + $0x70] sm:$0xff]  ;;  %v397_v15 = vpack.c.bf16 %v91_v8, %v89_v7  ;;  %v138_v16 = vld [vmem:[#allocation7 + $0x88] sm:$0xff]  ;;  %v399_v18 = vpack.c.bf16 %v96_v10, %v94_v9 }
  0x49   :  { %v140_v17 = vld [vmem:[#allocation7 + $0x98] sm:$0xff]  ;;  %v93_v19 = vld [vmem:[#allocation5 + $0x120] sm:$0xff]  ;;  %v95_v20 = vld [vmem:[#allocation5 + $0x130] sm:$0xff]  ;;  %v441_v23 = vpack.c.bf16 %v135_v14, %v133_v13 }
  0x4a   :  { %382 = vmatpush1.bf16.msra.mxu0 %v381_v31  ;;  %434 = vmatpush1.bf16.msra.mxu1 %v433_v63  ;;  %v98_v21 = vld [vmem:[#allocation5 + $0x148] sm:$0xff]  ;;  %v100_v22 = vld [vmem:[#allocation5 + $0x158] sm:$0xff]  ;;  %v443_v24 = vpack.c.bf16 %v140_v17, %v138_v16  ;;  %v137_v25 = vld [vmem:[#allocation7 + $0x80] sm:$0xff]  ;;  %v401_v27 = vpack.c.bf16 %v95_v20, %v93_v19 }
  0x4b   :  { %384 = vmatprep.subr.bf16.mxu0 %v383_v32  ;;  %436 = vmatprep.subr.bf16.mxu1 %v435_v0  ;;  %v139_v26 = vld [vmem:[#allocation7 + $0x90] sm:$0xff]  ;;  %v142_v28 = vld [vmem:[#allocation7 + $0xa8] sm:$0xff]  ;;  %v144_v29 = vld [vmem:[#allocation7 + $0xb8] sm:$0xff]  ;;  %v403_v30 = vpack.c.bf16 %v100_v22, %v98_v21 }
  0x4c   :  { %v97_v31 = vld [vmem:[#allocation5 + $0x140] sm:$0xff]  ;;  %v99_v32 = vld [vmem:[#allocation5 + $0x150] sm:$0xff]  ;;  %v102_v33 = vld [vmem:[#allocation5 + $0x168] sm:$0xff]  ;;  %v445_v35 = vpack.c.bf16 %v139_v26, %v137_v25  ;;  %v447_v36 = vpack.c.bf16 %v144_v29, %v142_v28 }
  0x4d   :  { %v104_v34 = vld [vmem:[#allocation5 + $0x178] sm:$0xff]  ;;  %v143_v38 = vld [vmem:[#allocation7 + $0xb0] sm:$0xff]  ;;  %v405_v39 = vpack.c.bf16 %v99_v32, %v97_v31  ;;  %v101_v43 = vld [vmem:[#allocation5 + $0x160] sm:$0xff] }
  0x4e   :  { %386 = vmatpush1.bf16.msra.mxu0 %v385_v37  ;;  %438 = vmatpush1.bf16.msra.mxu1 %v437_v11  ;;  %v141_v37 = vld [vmem:[#allocation7 + $0xa0] sm:$0xff]  ;;  %v148_v41 = vld [vmem:[#allocation7 + $0xd8] sm:$0xff]  ;;  %v407_v42 = vpack.c.bf16 %v104_v34, %v102_v33  ;;  %v103_v44 = vld [vmem:[#allocation5 + $0x170] sm:$0xff] }
  0x4f   :  { %388 = vmatprep.subr.bf16.mxu0 %v387_v40  ;;  %440 = vmatprep.subr.bf16.mxu1 %v439_v12  ;;  %v146_v40 = vld [vmem:[#allocation7 + $0xc8] sm:$0xff]  ;;  %v108_v46 = vld [vmem:[#allocation5 + $0x198] sm:$0xff]  ;;  %v449_v47 = vpack.c.bf16 %v143_v38, %v141_v37  ;;  %v145_v49 = vld [vmem:[#allocation7 + $0xc0] sm:$0xff] }
  0x50   :  { %v106_v45 = vld [vmem:[#allocation5 + $0x188] sm:$0xff]  ;;  %v451_v48 = vpack.c.bf16 %v148_v41, %v146_v40  ;;  %v147_v50 = vld [vmem:[#allocation7 + $0xd0] sm:$0xff]  ;;  %v152_v53 = vld [vmem:[#allocation7 + $0xf8] sm:$0xff] }
  0x51   :  { %v150_v52 = vld [vmem:[#allocation7 + $0xe8] sm:$0xff]  ;;  %v411_v54 = vpack.c.bf16 %v108_v46, %v106_v45  ;;  %v105_v55 = vld [vmem:[#allocation5 + $0x180] sm:$0xff]  ;;  %v107_v56 = vld [vmem:[#allocation5 + $0x190] sm:$0xff]  ;;  %v453_v59 = vpack.c.bf16 %v147_v50, %v145_v49 }
  0x52   :  { %390 = vmatpush1.bf16.msra.mxu0 %v389_v51  ;;  %442 = vmatpush1.bf16.msra.mxu1 %v441_v23  ;;  %v409_v51 = vpack.c.bf16 %v103_v44, %v101_v43  ;;  %v112_v58 = vld [vmem:[#allocation5 + $0x1b8] sm:$0xff]  ;;  %v455_v60 = vpack.c.bf16 %v152_v53, %v150_v52  ;;  %v149_v61 = vld [vmem:[#allocation7 + $0xe0] sm:$0xff]  ;;  %v151_v62 = vld [vmem:[#allocation7 + $0xf0] sm:$0xff]  ;;  %v413_v63 = vpack.c.bf16 %v107_v56, %v105_v55 }
  0x53   :  { %392 = vmatprep.subr.bf16.mxu0 %v391_v57  ;;  %444 = vmatprep.subr.bf16.mxu1 %v443_v24  ;;  %v110_v57 = vld [vmem:[#allocation5 + $0x1a8] sm:$0xff]  ;;  %v156_v1 = vld [vmem:[#allocation7 + $0x118] sm:$0xff]  ;;  %v111_v4 = vld [vmem:[#allocation5 + $0x1b0] sm:$0xff]  ;;  %v457_v7 = vpack.c.bf16 %v151_v62, %v149_v61 }
  0x54   :  { %v154_v0 = vld [vmem:[#allocation7 + $0x108] sm:$0xff]  ;;  %v415_v2 = vpack.c.bf16 %v112_v58, %v110_v57  ;;  %v153_v9 = vld [vmem:[#allocation7 + $0x100] sm:$0xff]  ;;  %v155_v10 = vld [vmem:[#allocation7 + $0x110] sm:$0xff] }
  0x55   :  { %v114_v5 = vld [vmem:[#allocation5 + $0x1c8] sm:$0xff]  ;;  %v459_v8 = vpack.c.bf16 %v156_v1, %v154_v0  ;;  %v160_v13 = vld [vmem:[#allocation7 + $0x138] sm:$0xff]  ;;  %v115_v16 = vld [vmem:[#allocation5 + $0x1d0] sm:$0xff]  ;;  %v461_v19 = vpack.c.bf16 %v155_v10, %v153_v9 }
  0x56   :  { %394 = vmatpush1.bf16.msra.mxu0 %v393_v3  ;;  %446 = vmatpush1.bf16.msra.mxu1 %v445_v35  ;;  %v109_v3 = vld [vmem:[#allocation5 + $0x1a0] sm:$0xff]  ;;  %v158_v12 = vld [vmem:[#allocation7 + $0x128] sm:$0xff]  ;;  %v159_v22 = vld [vmem:[#allocation7 + $0x130] sm:$0xff] }
  0x57   :  { %396 = vmatprep.subr.bf16.mxu0 %v395_v6  ;;  %448 = vmatprep.subr.bf16.mxu1 %v447_v36  ;;  %v116_v6 = vld [vmem:[#allocation5 + $0x1d8] sm:$0xff]  ;;  %v417_v11 = vpack.c.bf16 %v111_v4, %v109_v3  ;;  %v118_v17 = vld [vmem:[#allocation5 + $0x1e8] sm:$0xff]  ;;  %v463_v20 = vpack.c.bf16 %v160_v13, %v158_v12  ;;  %v157_v21 = vld [vmem:[#allocation7 + $0x120] sm:$0xff] }
  0x58   :  { %v419_v14 = vpack.c.bf16 %v116_v6, %v114_v5  ;;  %v162_v24 = vld [vmem:[#allocation7 + $0x148] sm:$0xff]  ;;  %v164_v25 = vld [vmem:[#allocation7 + $0x158] sm:$0xff]  ;;  %v119_v28 = vld [vmem:[#allocation5 + $0x1f0] sm:$0xff]  ;;  %v465_v29 = vpack.c.bf16 %v159_v22, %v157_v21  ;;  %v262_v6 = vlaneseq }
  0x59   :  { %v161_v31 = vld [vmem:[#allocation7 + $0x140] sm:$0xff]  ;;  %v163_v32 = vld [vmem:[#allocation7 + $0x150] sm:$0xff]  ;;  %v166_v34 = vld [vmem:[#allocation7 + $0x168] sm:$0xff] }
  0x5a   :  { %398 = vmatpush1.bf16.msra.mxu0 %v397_v15  ;;  %450 = vmatpush1.bf16.msra.mxu1 %v449_v47  ;;  %v113_v15 = vld [vmem:[#allocation5 + $0x1c0] sm:$0xff]  ;;  %v168_v35 = vld [vmem:[#allocation7 + $0x178] sm:$0xff]  ;;  %v469_v36 = vpack.c.bf16 %v163_v32, %v161_v31  ;;  %v185_v40 = vld [vmem:[#allocation2] sm:$0xff] }
  0x5b   :  { %400 = vmatprep.subr.bf16.mxu0 %v399_v18  ;;  %452 = vmatprep.subr.bf16.mxu1 %v451_v48  ;;  %v120_v18 = vld [vmem:[#allocation5 + $0x1f8] sm:$0xff]  ;;  %v421_v23 = vpack.c.bf16 %v115_v16, %v113_v15  ;;  %v471_v37 = vpack.c.bf16 %v168_v35, %v166_v34  ;;  %v165_v38 = vld [vmem:[#allocation7 + $0x160] sm:$0xff]  ;;  %v170_v41 = vld [vmem:[#allocation7 + $0x188] sm:$0xff] }
  0x5c   :  { %v423_v26 = vpack.c.bf16 %v120_v18, %v118_v17  ;;  %v169_v45 = vld [vmem:[#allocation7 + $0x180] sm:$0xff]  ;;  %v171_v46 = vld [vmem:[#allocation7 + $0x190] sm:$0xff]  ;;  %v174_v47 = vld [vmem:[#allocation7 + $0x1a8] sm:$0xff] }
  0x5d   :  { %v176_v48 = vld [vmem:[#allocation7 + $0x1b8] sm:$0xff]  ;;  %v477_v49 = vpack.c.bf16 %v171_v46, %v169_v45  ;;  %v175_v52 = vld [vmem:[#allocation7 + $0x1b0] sm:$0xff]  ;;  %v178_v53 = vld [vmem:[#allocation7 + $0x1c8] sm:$0xff] }
  0x5e   :  { %402 = vmatpush1.bf16.msra.mxu0 %v401_v27  ;;  %454 = vmatpush1.bf16.msra.mxu1 %v453_v59  ;;  %v117_v27 = vld [vmem:[#allocation5 + $0x1e0] sm:$0xff]  ;;  %v479_v50 = vpack.c.bf16 %v176_v48, %v174_v47  ;;  %v179_v58 = vld [vmem:[#allocation7 + $0x1d0] sm:$0xff]  ;;  %v184_v61 = vld [vmem:[#allocation7 + $0x1f8] sm:$0xff] }
  0x5f   :  { %404 = vmatprep.subr.bf16.mxu0 %v403_v30  ;;  %456 = vmatprep.subr.bf16.mxu1 %v455_v60  ;;  %v467_v30 = vpack.c.bf16 %v164_v25, %v162_v24  ;;  %v425_v33 = vpack.c.bf16 %v119_v28, %v117_v27  ;;  %v177_v57 = vld [vmem:[#allocation7 + $0x1c0] sm:$0xff]  ;;  %v182_v60 = vld [vmem:[#allocation7 + $0x1e8] sm:$0xff]  ;;  %v183_v0 = vld [vmem:[#allocation7 + $0x1f0] sm:$0xff] }
  0x60   :  { %v485_v59 = vpack.c.bf16 %v179_v58, %v177_v57  ;;  %v487_v62 = vpack.c.bf16 %v184_v61, %v182_v60  ;;  %v187_v9 = vld [vmem:[%s682_s3] sm:$0x3] }
  0x62   :  { %406 = vmatpush1.bf16.msra.mxu0 %v405_v39  ;;  %458 = vmatpush1.bf16.msra.mxu1 %v457_v7  ;;  %v167_v39 = vld [vmem:[#allocation7 + $0x170] sm:$0xff]  ;;  %v263_v7 = vshrl.u32 %v262_v6, 7 }
  0x63   :  { %408 = vmatprep.subr.bf16.mxu0 %v407_v42  ;;  %460 = vmatprep.subr.bf16.mxu1 %v459_v8  ;;  %v172_v42 = vld [vmem:[#allocation7 + $0x198] sm:$0xff]  ;;  %v473_v43 = vpack.c.bf16 %v167_v39, %v165_v38 }
  0x64   :  { %v475_v44 = vpack.c.bf16 %v172_v42, %v170_v41  ;;  %v264_v8 = vsub.s32 0, %v263_v7  ;;  %v268_v10 = vsub.s32 1, %v263_v7 }
  0x66   :  { %410 = vmatpush1.bf16.msra.mxu0 %v409_v51  ;;  %462 = vmatpush1.bf16.msra.mxu1 %v461_v19  ;;  %v173_v51 = vld [vmem:[#allocation7 + $0x1a0] sm:$0xff]  ;;  %v269_v12 = vrot.slane %v187_v9, %v268_v10 }
  0x67   :  { %412 = vmatprep.subr.bf16.mxu0 %v411_v54  ;;  %464 = vmatprep.subr.bf16.mxu1 %v463_v20  ;;  %v180_v54 = vld [vmem:[#allocation7 + $0x1d8] sm:$0xff]  ;;  %v481_v55 = vpack.c.bf16 %v175_v52, %v173_v51 }
  0x68   :  { %v483_v56 = vpack.c.bf16 %v180_v54, %v178_v53 }
  0x6a   :  { %414 = vmatpush1.bf16.msra.mxu0 %v413_v63  ;;  %466 = vmatpush1.bf16.msra.mxu1 %v465_v29  ;;  %v181_v63 = vld [vmem:[#allocation7 + $0x1e0] sm:$0xff] }
  0x6b   :  { %416 = vmatprep.subr.bf16.mxu0 %v415_v2  ;;  %468 = vmatprep.subr.bf16.mxu1 %v467_v30  ;;  %v489_v1 = vpack.c.bf16 %v183_v0, %v181_v63 }
  0x6e   :  { %418 = vmatpush1.bf16.msra.mxu0 %v417_v11  ;;  %470 = vmatpush1.bf16.msra.mxu1 %v469_v36  ;;  %v265_v11 = vrot.slane %v187_v9, %v264_v8 }
  0x6f   :  { %420 = vmatprep.subr.bf16.mxu0 %v419_v14  ;;  %472 = vmatprep.subr.bf16.mxu1 %v471_v37 }
  0x72   :  { %422 = vmatpush1.bf16.msra.mxu0 %v421_v23  ;;  %474 = vmatpush1.bf16.msra.mxu1 %v473_v43 }
  0x73   :  { %424 = vmatprep.subr.bf16.mxu0 %v423_v26  ;;  %476 = vmatprep.subr.bf16.mxu1 %v475_v44 }
  0x76   :  { %426 = vmatpush1.bf16.msra.mxu0 %v425_v33  ;;  %478 = vmatpush1.bf16.msra.mxu1 %v477_v49 }
  0x77   :  { %480 = vmatprep.subr.bf16.mxu1 %v479_v50 }
  0x79   :  { %253 = vmatmul.mubr.f32.vlgmr.msra.gmra.mrb[0].mxu0 %v185_v40 }
  0x7a   :  { %482 = vmatpush1.bf16.msra.mxu1 %v481_v55 }
  0x7b   :  { %484 = vmatprep.subr.bf16.mxu1 %v483_v56 }
  0x7e   :  { %486 = vmatpush1.bf16.msra.mxu1 %v485_v59 }
  0x7f   :  { %488 = vmatprep.subr.bf16.mxu1 %v487_v62 }
  0x82   :  { %490 = vmatpush1.bf16.msra.mxu1 %v489_v1 }
 0x14c   :  { %v254_v2 = vpop.f32.mrb[0].mxu0 }
 0x14d   :  { %v256_v3 = vpop.f32.mrb[1].mxu0  ;;  %v259_v5 = vmax.f32 %v254_v2, 0.0 }
 0x14e   :  { %v260_v4 = vmax.f32 %v256_v3, 0.0 }
 0x150   :  { %336 = vmatprep.mubr.f32.mxu1 %v260_v4 }
 0x151   :  { %337 = vmatmul.mubr.f32.vlgmr.msra.gmra.mrb[0].mxu1 %v259_v5 }
 0x224   :  { %v338_v13 = vpop.f32.mrb[0].mxu1 }
 0x225   :  { %v339_v14 = vadd.f32 %v338_v13, %v265_v11  ;;  %v340_v15 = vpop.f32.mrb[1].mxu1 }
 0x226   :  { %v341_v16 = vadd.f32 %v340_v15, %v269_v12 }
 0x227   :  { %v343_v17 = vmax.f32 %v339_v14, 0.0 }
 0x228   :  { %v344_v18 = vmax.f32 %v341_v16, 0.0 }
 0x229   :  { %345 = vst [vmem:[#allocation8] sm:$0xff] %v343_v17 }
 0x22a   :  { %346 = vst [vmem:[#allocation8 + $0x8] sm:$0xff] %v344_v18 }
 0x22b   :  { %574 = shalt.err (!%p571_p0)
}
 0x22c   :  { %s575_s30 = scalar_lea.hbm %s683_s4, 256 }
 0x22d   :  { %p576_p1 = scmp.ne.s32.totalorder %s683_s4, %s575_s30  ;;  %p579_p2 = scmp.lt.u32.totalorder %s575_s30, %s683_s4 }
 0x22f   :  { %p581_p3 = pnand %p579_p2, %p576_p1 }
 0x231   :  { %584 = shalt.err (!%p581_p3)
}
 0x232   :  { %356 = dma.vmem_to_hbm [thread:$0]  %s354_s27, 256, %s683_s4, [#allocation4]  }
 0x233   :  { %589 = dma.done.wait [#allocation4], 256  }
 0x234   :  { %590 = vsyncadd [#allocation4], 4294967040 }
 0x235   :  { %360 = vsyncpa [#allocation3], 1 }
 0x236   :  { %361 = vsyncpa [#allocation6], 1 }
 0x237   :  { %362 = vsyncpa [#allocation4], 1 }

</bundles_post_ra>
